<compile_context>
chip_gen: v7x
topology: tpu7x:2x2x1
jax: 0.10.0
libtpu: 0.0.40
codegen_flags: <defaults>
</compile_context>

<pallas_src>
import functools
import math

import jax
import jax.numpy as jnp
from jax import lax
from jax.experimental import pallas as pl
from jax.experimental.pallas import tpu as pltpu


_LOG_EPS = math.log(1e-7)
_SUBLANES = 8
_LANES = 128


def _round_up(x, m):
    return ((x + m - 1) // m) * m


# ---------------------------------------------------------------------------
# Kernel
# ---------------------------------------------------------------------------
def _jsd_kernel(labels_ref, *refs, weights, tiles_per_split, tile_b, batch,
                needs_row_mask):
    # labels_ref : (TB, 1)  int32 class ids (edge-tile garbage rows masked)
    # refs       : pred_ref_0..pred_ref_{N-1} each (TB, C) native-dtype logits,
    #              then out_ref (1, 8, C) f32 resident partial-sum block.
    num_preds = len(weights) - 1
    pred_refs = refs[:num_preds]
    out_ref = refs[num_preds]

    s = pl.program_id(0)          # split axis (CORE_PARALLEL on v7x)
    b = pl.program_id(1)          # batch-tile reduction axis ('arbitrary')

    @pl.when(b == 0)
    def _():
        out_ref[...] = jnp.zeros_like(out_ref)

    tb, c = pred_refs[0].shape

    # One-hot built in-kernel with the weight folded straight in: no streamed
    # one-hot tensor, no (TB,C) temp, no full-width multiply.
    lab = labels_ref[...]                                       # (TB, 1) int32
    col = lax.broadcasted_iota(jnp.int32, (tb, c), 1)
    mean_d = jnp.where(col == lab, jnp.float32(weights[0]), jnp.float32(0.0))

    ent = None                                   # sum_i w_i * p_i * log p_i
    for i in range(num_preds):
        logits = pred_refs[i][...].astype(jnp.float32)          # cast after load
        m = jnp.max(logits, axis=1, keepdims=True)
        z = logits - m
        e = jnp.exp(z)
        ssum = jnp.sum(e, axis=1, keepdims=True)
        # Per-head weight folded into the (TB,1) reciprocal: saves one
        # full-width VPU multiply per head.
        wrecip = jnp.float32(weights[i + 1]) * pl.reciprocal(ssum, approx=False)
        wp = e * wrecip                                         # w_i * softmax
        # log(clamp(p, 1e-7)) == max(log_softmax, log 1e-7) exactly.
        logp = jnp.maximum(z - jnp.log(ssum), _LOG_EPS)
        mean_d = mean_d + wp
        contrib = wp * logp
        ent = contrib if ent is None else ent + contrib

    log_mean = jnp.log(jnp.clip(mean_d, 1e-7, 1.0))
    # B * sum_i w_i * kl(d_i) == sum(ent) - sum(mean_d * log_mean)
    # (the one-hot's own entropy term is identically zero).
    term = ent - mean_d * log_mean                              # (TB, C)

    def _accum(t):
        # Sublane-group reshape is tile-aligned (layout-free); the sum over
        # the leading axis is pure VPU vreg adds — no per-tile cross-lane
        # reduction (final scalar reduce happens once in the wrapper).
        upd = t.reshape(tb // _SUBLANES, _SUBLANES, c).sum(axis=0)   # (8, C)
        out_ref[...] = out_ref[...] + upd[None]

    if needs_row_mask:
        # Only the globally-last tile can contain out-of-bounds rows; every
        # other tile takes the unmasked fast path.
        row0 = (s * tiles_per_split + b) * tile_b
        is_edge = row0 + tile_b > batch

        @pl.when(is_edge)
        def _():
            rows = row0 + lax.broadcasted_iota(jnp.int32, (tb, 1), 0)
            _accum(jnp.where(rows < batch, term, 0.0))

        @pl.when(jnp.logical_not(is_edge))
        def _():
            _accum(term)
    else:
        _accum(term)


# ---------------------------------------------------------------------------
# Wrapper
# ---------------------------------------------------------------------------
def _vmem_limit_bytes():
    cap = None
    try:
        cap = getattr(pltpu.get_tpu_info(), "vmem_capacity_bytes", None)
    except Exception:
        cap = None
    if not cap:
        cap = 64 * 1024 * 1024               # conservative: v7x physical VMEM
    # Well above the 16/32 MiB scoped defaults, with headroom under physical:
    # v7x (64 MiB) -> 48 MiB, v5e/v6e (128 MiB) -> 96 MiB.
    return int(min(96 * 1024 * 1024, (cap * 3) // 4))


def _is_v7x():
    try:
        return "v7" in jax.devices()[0].device_kind.lower()
    except Exception:
        return False


def _choose_tile(batch, n_classes, n_heads, in_itemsize, vmem_budget):
    c_pad = _round_up(n_classes, _LANES)       # lane-padded VMEM layout
    # Fixed cost: resident (8, C) f32 output block (double-buffer worst case).
    fixed = 2 * _SUBLANES * c_pad * 4
    # Per-row cost: double-buffered native-dtype logits per head,
    # double-buffered lane-padded int32 labels, ~6 live (tb, c_pad) f32 temps.
    per_row = (2 * n_heads * c_pad * in_itemsize
               + 2 * _LANES * 4
               + 6 * c_pad * 4)
    avail = max(per_row * _SUBLANES, vmem_budget - fixed)
    tb_cap = max(_SUBLANES, (avail // per_row) // _SUBLANES * _SUBLANES)
    # Amortize the ~0.35us per-grid-step overhead: aim for >= ~1 MiB of
    # streamed logits per step.
    dma_rows = -(-(1 << 20) // max(1, n_heads * n_classes * in_itemsize))
    tb_target = max(_SUBLANES, _round_up(dma_rows, _SUBLANES))
    return min(tb_cap, tb_target, _round_up(batch, _SUBLANES))


def jsd_weighted_scaled(pred, labels, num_classes, weights_str, *,
                        num_splits=None):
    """JAX/Pallas equivalent of JensenShannonDivergenceWeightedScaled.forward.

    pred: (B, C) array of logits or list of (B, C) arrays.
    labels: (B,) int array of class indices.
    """
    weights = tuple(float(w) for w in weights_str.split(','))
    assert abs(1.0 - sum(weights)) < 0.001
    assert 0.0 < weights[0] < 1.0, "scale is undefined for w0 in {0, 1}"
    scale = -1.0 / ((1.0 - weights[0]) * math.log(1.0 - weights[0]))

    pred_list = list(pred) if isinstance(pred, (list, tuple)) else [pred]
    assert len(weights) == len(pred_list) + 1
    num_preds = len(pred_list)

    B, C = pred_list[0].shape
    assert C == num_classes
    for p in pred_list:
        assert p.shape == (B, C)

    in_itemsize = max(jnp.dtype(p.dtype).itemsize for p in pred_list)
    vmem_limit = _vmem_limit_bytes()
    tb = _choose_tile(B, C, num_preds, in_itemsize, (vmem_limit * 3) // 5)
    n_tiles = -(-B // tb)

    # Only split across cores on chips that actually have 2 TensorCores (v7x);
    # on v5e/v6e a split is just a serial loop plus padded-row waste.
    if num_splits is None:
        num_splits = 2 if (_is_v7x() and n_tiles >= 2) else 1
    if num_splits > 1 and n_tiles % num_splits != 0:
        num_splits = 1                       # avoid fully out-of-bounds blocks
    needs_mask = (n_tiles * tb != B)

    # Labels streamed as a tiny (B, 1) int32 column; logits streamed per-head
    # in their NATIVE dtype — no stack, no pad copies.
    labels2d = labels.astype(jnp.int32).reshape(B, 1)

    def _run(splits, semantics):
        tps = n_tiles // splits
        idx = lambda s, b: (s * tps + b, 0)
        kernel = functools.partial(
            _jsd_kernel, weights=weights, tiles_per_split=tps, tile_b=tb,
            batch=B, needs_row_mask=needs_mask)
        return pl.pallas_call(
            kernel,
            out_shape=jax.ShapeDtypeStruct((splits, _SUBLANES, C), jnp.float32),
            grid=(splits, tps),
            in_specs=[pl.BlockSpec((tb, 1), idx)]
                     + [pl.BlockSpec((tb, C), idx) for _ in pred_list],
            out_specs=pl.BlockSpec((1, _SUBLANES, C), lambda s, b: (s, 0, 0)),
            compiler_params=pltpu.CompilerParams(
                dimension_semantics=semantics,
                vmem_limit_bytes=vmem_limit),
        )(labels2d, *pred_list)

    arb = getattr(pltpu, "ARBITRARY", "arbitrary")
    partials = None
    if num_splits == 2:
        core_par = getattr(pltpu, "CORE_PARALLEL", None)
        if core_par is not None:
            try:
                partials = _run(2, (core_par, arb))       # v7x: both TCs
            except Exception:
                partials = None                           # safe fallback
    if partials is None:
        partials = _run(1, (arb, arb))

    # Finalize: one cross-lane reduce in XLA, divide by the *actual* batch.
    return scale * jnp.sum(partials) / B


# ---------------------------------------------------------------------------
# Pure-JAX reference mirroring the PyTorch module
# ---------------------------------------------------------------------------
def _jsd_reference(pred, labels, num_classes, weights_str):
    weights = [float(w) for w in weights_str.split(',')]
    scale = -1.0 / ((1.0 - weights[0]) * math.log(1.0 - weights[0]))
    pred_list = pred if isinstance(pred, (list, tuple)) else [pred]
    preds = [jax.nn.softmax(p.astype(jnp.float32), axis=1) for p in pred_list]
    onehot = jax.nn.one_hot(labels, num_classes, dtype=jnp.float32)
    distribs = [onehot] + preds
    mean_d = sum(w * d for w, d in zip(weights, distribs))
    log_mean = jnp.log(jnp.clip(mean_d, 1e-07, 1.0))

    def kl(target):
        out_pos = target * (jnp.log(jnp.clip(target, 1e-07, None)) - log_mean)
        out = jnp.where(target > 0, out_pos, 0.0)
        return jnp.mean(jnp.sum(out, axis=1))

    jsw = sum(w * kl(d) for w, d in zip(weights, distribs))
    return scale * jsw


if __name__ == "__main__":
    key = jax.random.PRNGKey(0)
    k1, k2, k3, k4 = jax.random.split(key, 4)

    # 1) Single f32 head, small C.
    B, C = 8, 32
    labels = jax.random.randint(k3, (B,), 0, C, dtype=jnp.int32)
    pred = jax.random.normal(k1, (B, C), dtype=jnp.float32)
    out1 = jax.block_until_ready(jsd_weighted_scaled(pred, labels, C, "0.5,0.5"))
    ref1 = _jsd_reference(pred, labels, C, "0.5,0.5")
    assert jnp.allclose(out1, ref1, rtol=1e-5, atol=1e-5), (out1, ref1)

    # 2) Two bf16 heads, ragged batch (exercises the edge-tile row mask,
    #    no wrapper-side padding).
    B2, C2 = 13, 32
    labels2 = jax.random.randint(k4, (B2,), 0, C2, dtype=jnp.int32)
    preds2 = [jax.random.normal(k1, (B2, C2), dtype=jnp.bfloat16),
              jax.random.normal(k2, (B2, C2), dtype=jnp.bfloat16)]
    out2 = jax.block_until_ready(
        jsd_weighted_scaled(preds2, labels2, C2, "0.4,0.3,0.3"))
    ref2 = _jsd_reference(preds2, labels2, C2, "0.4,0.3,0.3")
    assert jnp.allclose(out2, ref2, rtol=1e-5, atol=1e-5), (out2, ref2)

    # 3) Lane-dense C (exercises the vreg-shaped (8, C) accumulator cleanly).
    B3, C3 = 16, 128
    labels3 = jax.random.randint(k3, (B3,), 0, C3, dtype=jnp.int32)
    preds3 = [jax.random.normal(k1, (B3, C3), dtype=jnp.bfloat16),
              jax.random.normal(k2, (B3, C3), dtype=jnp.bfloat16)]
    out3 = jax.block_until_ready(
        jsd_weighted_scaled(preds3, labels3, C3, "0.4,0.3,0.3"))
    ref3 = _jsd_reference(preds3, labels3, C3, "0.4,0.3,0.3")
    assert jnp.allclose(out3, ref3, rtol=1e-5, atol=1e-5), (out3, ref3)

    print("KERNEL_OK")
</pallas_src>

<mosaic_0001>
module attributes {stable_mosaic.version = 11 : i64} {
  func.func @_jsd_kernel(%arg0: i32, %arg1: i32, %arg2: memref<8x1xi32, #tpu.memory_space<vmem>>, %arg3: memref<8x32xf32, #tpu.memory_space<vmem>>, %arg4: memref<1x8x32xf32, #tpu.memory_space<vmem>>) attributes {dimension_semantics = [#tpu.dimension_semantics<arbitrary>, #tpu.dimension_semantics<arbitrary>], iteration_bounds = array<i64: 1, 1>, scalar_prefetch = 0 : i64, scratch_operands = 0 : i64, tpu.core_type = #tpu.core_type<tc>, window_params = [{transform_indices = @transform_0, window_bounds = array<i64: 8, 1>}, {transform_indices = @transform_1, window_bounds = array<i64: 8, 32>}, {transform_indices = @transform_2, window_bounds = array<i64: 1, 8, 32>}]} {
    %c0_i32 = arith.constant 0 : i32
    %0 = arith.cmpi eq, %arg1, %c0_i32 : i32
    %1 = arith.extui %0 : i1 to i32
    %c0_i32_0 = arith.constant 0 : i32
    %2 = arith.cmpi ne, %1, %c0_i32_0 : i32
    scf.if %2 {
      %cst_18 = arith.constant 0.000000e+00 : f32
      %43 = vector.broadcast %cst_18 : f32 to vector<1x8x32xf32>
      %c0_19 = arith.constant 0 : index
      %c0_20 = arith.constant 0 : index
      %c0_21 = arith.constant 0 : index
      %44 = vector.load %arg4[%c0_19, %c0_20, %c0_21] : memref<1x8x32xf32, #tpu.memory_space<vmem>>, vector<1x8x32xf32>
      tpu.vector_store %arg4[%c0_19, %c0_20, %c0_21], %43 {strides = array<i32>} : memref<1x8x32xf32, #tpu.memory_space<vmem>>, vector<1x8x32xf32>,
    } else {
    }
    %c0 = arith.constant 0 : index
    %c0_1 = arith.constant 0 : index
    %3 = vector.load %arg2[%c0, %c0_1] : memref<8x1xi32, #tpu.memory_space<vmem>>, vector<8x1xi32>
    %4 = tpu.iota {dimensions = array<i32: 1>} : vector<8x32xi32>
    %5 = vector.broadcast %3 : vector<8x1xi32> to vector<8x32xi32>
    %6 = arith.cmpi eq, %4, %5 : vector<8x32xi32>
    %cst = arith.constant 5.000000e-01 : f32
    %cst_2 = arith.constant 0.000000e+00 : f32
    %7 = vector.broadcast %cst : f32 to vector<8x32xf32>
    %8 = vector.broadcast %cst_2 : f32 to vector<8x32xf32>
    %9 = arith.select %6, %7, %8 : vector<8x32xi1>, vector<8x32xf32>
    %c0_3 = arith.constant 0 : index
    %c0_4 = arith.constant 0 : index
    %10 = vector.load %arg3[%c0_3, %c0_4] : memref<8x32xf32, #tpu.memory_space<vmem>>, vector<8x32xf32>
    %cst_5 = arith.constant dense<0xFF800000> : vector<8xf32>
    %11 = vector.multi_reduction <maximumf>, %10, %cst_5 [1] : vector<8x32xf32> to vector<8xf32>
    %12 = vector.shape_cast %11 : vector<8xf32> to vector<8x1xf32>
    %13 = vector.broadcast %12 : vector<8x1xf32> to vector<8x32xf32>
    %14 = arith.subf %10, %13 : vector<8x32xf32>
    %15 = math.exp %14 : vector<8x32xf32>
    %cst_6 = arith.constant dense<0.000000e+00> : vector<8xf32>
    %16 = vector.multi_reduction <add>, %15, %cst_6 [1] : vector<8x32xf32> to vector<8xf32>
    %17 = vector.shape_cast %16 : vector<8xf32> to vector<8x1xf32>
    %18 = tpu.reciprocal %17 : vector<8x1xf32> -> vector<8x1xf32>
    %cst_7 = arith.constant 5.000000e-01 : f32
    %19 = vector.broadcast %cst_7 : f32 to vector<8x1xf32>
    %20 = arith.mulf %19, %18 : vector<8x1xf32>
    %21 = vector.broadcast %20 : vector<8x1xf32> to vector<8x32xf32>
    %22 = arith.mulf %15, %21 : vector<8x32xf32>
    %23 = math.log %17 : vector<8x1xf32>
    %24 = vector.broadcast %23 : vector<8x1xf32> to vector<8x32xf32>
    %25 = arith.subf %14, %24 : vector<8x32xf32>
    %cst_8 = arith.constant -16.1180954 : f32
    %26 = vector.broadcast %cst_8 : f32 to vector<8x32xf32>
    %27 = arith.maximumf %25, %26 : vector<8x32xf32>
    %28 = arith.addf %9, %22 : vector<8x32xf32>
    %29 = arith.mulf %22, %27 : vector<8x32xf32>
    %cst_9 = arith.constant 1.000000e-07 : f32
    %cst_10 = arith.constant 1.000000e+00 : f32
    %30 = vector.broadcast %cst_9 : f32 to vector<8x32xf32>
    %31 = arith.maximumf %30, %28 : vector<8x32xf32>
    %32 = vector.broadcast %cst_10 : f32 to vector<8x32xf32>
    %33 = arith.minimumf %32, %31 : vector<8x32xf32>
    %34 = math.log %33 : vector<8x32xf32>
    %35 = arith.mulf %28, %34 : vector<8x32xf32>
    %36 = arith.subf %29, %35 : vector<8x32xf32>
    %37 = vector.shape_cast %36 : vector<8x32xf32> to vector<1x8x32xf32>
    %cst_11 = arith.constant dense<0.000000e+00> : vector<8x32xf32>
    %38 = vector.multi_reduction <add>, %37, %cst_11 [0] : vector<1x8x32xf32> to vector<8x32xf32>
    %c0_12 = arith.constant 0 : index
    %c0_13 = arith.constant 0 : index
    %c0_14 = arith.constant 0 : index
    %39 = vector.load %arg4[%c0_12, %c0_13, %c0_14] : memref<1x8x32xf32, #tpu.memory_space<vmem>>, vector<1x8x32xf32>
    %40 = vector.shape_cast %38 : vector<8x32xf32> to vector<1x8x32xf32>
    %41 = arith.addf %39, %40 : vector<1x8x32xf32>
    %c0_15 = arith.constant 0 : index
    %c0_16 = arith.constant 0 : index
    %c0_17 = arith.constant 0 : index
    %42 = vector.load %arg4[%c0_15, %c0_16, %c0_17] : memref<1x8x32xf32, #tpu.memory_space<vmem>>, vector<1x8x32xf32>
    tpu.vector_store %arg4[%c0_15, %c0_16, %c0_17], %41 {strides = array<i32>} : memref<1x8x32xf32, #tpu.memory_space<vmem>>, vector<1x8x32xf32>,
    return
  }
  func.func @transform_0(%arg0: i32, %arg1: i32) -> (i32, i32) {
    %c1_i32 = arith.constant 1 : i32
    %0 = arith.muli %arg0, %c1_i32 : i32
    %1 = arith.addi %0, %arg1 : i32
    %c0_i32 = arith.constant 0 : i32
    %c0_i32_0 = arith.constant 0 : i32
    return %1, %c0_i32 : i32, i32
  }
  func.func @transform_1(%arg0: i32, %arg1: i32) -> (i32, i32) {
    %c1_i32 = arith.constant 1 : i32
    %0 = arith.muli %arg0, %c1_i32 : i32
    %1 = arith.addi %0, %arg1 : i32
    %c0_i32 = arith.constant 0 : i32
    %c0_i32_0 = arith.constant 0 : i32
    return %1, %c0_i32 : i32, i32
  }
  func.func @transform_2(%arg0: i32, %arg1: i32) -> (i32, i32, i32) {
    %c0_i32 = arith.constant 0 : i32
    %c0_i32_0 = arith.constant 0 : i32
    %c0_i32_1 = arith.constant 0 : i32
    return %arg0, %c0_i32, %c0_i32_0 : i32, i32, i32
  }
}

</mosaic_0001>

<bundles_post_ra>
// kernel: tpu_custom_call.1
= control target key start
LH: loop header
LB: loop body
LE: loop exit
PB: predicated region body
PF: predicated region fallthrough
CT: control target
= control target key end

     0   :  { %vm50_vm0 = vcmask 261120   ;;  %s193_s0 = inlined_call_operand.vmem [shape: s32[8,1], index: 0, kind: input, shape index: {}]   ;;  %s194_s1 = inlined_call_operand.vmem [shape: f32[8,32], index: 1, kind: input, shape index: {}]   ;;  %s195_s2 = inlined_call_operand.hbm [shape: f32[1,8,32], index: 2, kind: output, shape index: {}]  }
   0x1   :  { %v60_v0 = vld [vmem:[%s194_s1] sm:$0xff] }
   0x2   :  { %7 = vsyncpa [#allocation3], 0  ;;  %v62_v1 = vsel %vm50_vm0, %v60_v0, -inf  ;;  %v52_v2 = vld [vmem:[%s193_s0] sm:$0xff]  ;;  %v153_v3 = vmov 0   ;;  %v154_v9 = vmov 0.0   ;;  %v53_v11 = vlaneseq }
   0x3   :  { %63 = vmax.xlane.f32.xlu0 %v62_v1  ;;  %119 = vset.pattern.permute.xlu1 %v153_v3  ;;  %51 = vst.msk [vmem:[#allocation2] sm:$0xff] %vm50_vm0, %v154_v9  ;;  %s155_s0 = smov [#allocation2]  }
   0x4   :  { %120 = vset.pattern.permute.xlu0 %v153_v3  ;;  %56 = vperm.xlu1 %119, %v52_v2   ;;  %v54_v12 = vand.u32 127, %v53_v11  ;;  %s96_s1 = sshll.u32 %s155_s0, 4  ;;  %s97_s1 = int_to_ptr.vmem [resolvable:$true] %s96_s1 }
   0x5   :  { %s129_s13 = scalar_lea.vmem %s97_s1, 128  ;;  %p134_p1 = scmp.lt.s32.totalorder %s97_s1, %s97_s1 }
   0x6   :  { %p130_p0 = scmp.ne.s32.totalorder %s97_s1, %s129_s13  ;;  %p135_p2 = scmp.lt.s32.totalorder %s129_s13, %s129_s13 }
   0x8   :  { %p136_p3 = por %p135_p2, %p134_p1 }
   0xa   :  { %v87_v29 = vld [vmem:[#allocation2] sm:$0xff]  ;;  %p137_p4 = pnand %p136_p3, %p130_p0 }
  0x83   :  { %v57_v13 = vpop.permute.xlu1 %56 }
  0x84   :  { %vm58_vm1 = vcmp.eq.s32.totalorder %v54_v12, %v57_v13 }
  0x85   :  { %v59_v16 = vsel %vm58_vm1, 0.5, %v154_v9 }
  0x90   :  { %v64_v4 = vpop.xlane.xlu0 %63 }
  0x91   :  { %v65_v5 = vsub.f32 %v60_v0, %v64_v4 }
  0x93   :  { %v66_v6 = vmul.f32 1.442695, %v65_v5 }
  0x95   :  { %121 = vpow2.f32 %v66_v6 }
  0x9f   :  { %v122_v7 = vpop.eup %121 }
  0xa0   :  { %v68_v8 = vsel %vm50_vm0, %v122_v7, 0.0 }
  0xa1   :  { %69 = vadd.xlane.f32.xlu0 %v68_v8 }
 0x12e   :  { %v70_v10 = vpop.xlane.xlu0 %69 }
 0x12f   :  { %123 = vrcp.f32 %v70_v10 }
 0x130   :  { %125 = vlog2.f32 %v70_v10 }
 0x139   :  { %v124_v14 = vpop.eup %123 }
 0x13a   :  { %v72_v15 = vmul.f32 0.5, %v124_v14  ;;  %v126_v20 = vpop.eup %125 }
 0x13b   :  { %v75_v22 = vmul.f32 0.6931472, %v126_v20 }
 0x13c   :  { %v73_v17 = vmul.f32 %v122_v7, %v72_v15 }
 0x13d   :  { %v76_v23 = vsub.f32 %v65_v5, %v75_v22 }
 0x13e   :  { %v78_v18 = vadd.f32 %v73_v17, %v59_v16 }
 0x13f   :  { %v77_v24 = vmax.f32 %v76_v23, -16.118095 }
 0x140   :  { %v80_v19 = vmax.f32 %v78_v18, 1e-07 }
 0x141   :  { %v79_v27 = vmul.f32 %v77_v24, %v73_v17 }
 0x142   :  { %v81_v21 = vmin.f32 %v80_v19, 1.0 }
 0x144   :  { %127 = vlog2.f32 %v81_v21 }
 0x14e   :  { %v128_v25 = vpop.eup %127 }
 0x14f   :  { %v83_v26 = vmul.f32 0.6931472, %v128_v25 }
 0x151   :  { %v84_v28 = vmul.f32 %v83_v26, %v78_v18 }
 0x153   :  { %v85_v30 = vsub.f32 %v79_v27, %v84_v28 }
 0x155   :  { %v88_v31 = vadd.f32 %v87_v29, %v85_v30 }
 0x157   :  { %89 = vst.msk [vmem:[#allocation2] sm:$0xff] %vm50_vm0, %v88_v31 }
 0x158   :  { %140 = shalt.err (!%p137_p4)
}
 0x159   :  { %s141_s16 = scalar_lea.hbm %s195_s2, 128 }
 0x15a   :  { %p142_p5 = scmp.ne.s32.totalorder %s195_s2, %s141_s16  ;;  %p145_p6 = scmp.lt.u32.totalorder %s141_s16, %s195_s2 }
 0x15c   :  { %p147_p7 = pnand %p145_p6, %p142_p5 }
 0x15e   :  { %150 = shalt.err (!%p147_p7)
}
 0x15f   :  { %99 = dma.vmem_to_hbm [thread:$0]  %s97_s1, 128, %s195_s2, [#allocation3]  }
 0x160   :  { %151 = dma.done.wait [#allocation3], 128  }
 0x161   :  { %152 = vsyncadd [#allocation3], 4294967168 }
 0x162   :  { %103 = vsyncpa [#allocation3], 1 }

</bundles_post_ra>
